<compile_context>
chip_gen: v7x
topology: tpu7x:2x2x1
jax: 0.10.0
libtpu: 0.0.40
codegen_flags: <defaults>
</compile_context>

<pallas_src>
import functools

import jax
import jax.numpy as jnp
from jax.experimental import pallas as pl
from jax.experimental.pallas import tpu as pltpu

hidden_size = 256
logstd_max = 2.0
logstd_min = -20.0


def _round_up(n, m):
    return ((n + m - 1) // m) * m


def actor_kernel(x_ref, w1_ref, b1_ref, w2_ref, b2_ref, wh_ref, bh_ref,
                 out_ref, *, out_size):
    # fc1 + relu (MXU in bf16, f32 accumulate / elementwise)
    h1 = jnp.dot(x_ref[...], w1_ref[...], preferred_element_type=jnp.float32)
    h1 = jnp.maximum(h1 + b1_ref[...], 0.0)

    # fc2 + relu
    h2 = jnp.dot(h1.astype(w2_ref.dtype), w2_ref[...],
                 preferred_element_type=jnp.float32)
    h2 = jnp.maximum(h2 + b2_ref[...], 0.0)

    # fused heads: [TB, n_pad] = h2 @ [hidden, n_pad] + [1, n_pad]
    heads = jnp.dot(h2.astype(wh_ref.dtype), wh_ref[...],
                    preferred_element_type=jnp.float32) + bh_ref[...]

    # clamp only the logstd half (cols >= out_size); mean half passes through.
    # Padded columns (>= 2*out_size) are sliced off in the wrapper, so clamping
    # them too is harmless.
    cols = jax.lax.broadcasted_iota(jnp.int32, heads.shape, 1)
    clipped = jnp.clip(heads, logstd_min, logstd_max)
    out_ref[...] = jnp.where(cols >= out_size, clipped, heads)


@functools.partial(jax.jit, static_argnames=("block_b", "use_bf16"))
def actor_forward(x, params, *, block_b=512, use_bf16=True):
    """x: [B, input_size] float32. Returns (mean, logstd), both [B, output_size] f32."""
    w1, b1, w2, b2, wm, bm, wls, bls = params
    B, in_size = x.shape
    out_size = wm.shape[1]
    n2 = 2 * out_size
    n_pad = _round_up(max(n2, 128), 128)   # lane-dense output slab width

    # Fuse the two heads into one lane-padded weight/bias.
    wh = jnp.concatenate([wm, wls], axis=1)                    # [hidden, 2*out]
    bh = jnp.concatenate([bm, bls], axis=1)                    # [1, 2*out]
    if n_pad != n2:
        wh = jnp.pad(wh, ((0, 0), (0, n_pad - n2)))
        bh = jnp.pad(bh, ((0, 0), (0, n_pad - n2)))

    mxu_dtype = jnp.bfloat16 if use_bf16 else jnp.float32
    xk = x.astype(mxu_dtype)
    w1k = w1.astype(mxu_dtype)
    w2k = w2.astype(mxu_dtype)
    whk = wh.astype(mxu_dtype)

    # Batch tile: up to `block_b` rows, multiple of 8 sublanes; pad B to a multiple.
    tb = min(block_b, _round_up(B, 8))
    nb = pl.cdiv(B, tb)
    b_pad = nb * tb
    if b_pad != B:
        xk = jnp.pad(xk, ((0, b_pad - B), (0, 0)))

    x_spec = pl.BlockSpec((tb, in_size), lambda i: (i, 0))
    out_spec = pl.BlockSpec((tb, n_pad), lambda i: (i, 0))

    def resident(shape):  # weights/biases: whole array, constant index -> VMEM-resident
        return pl.BlockSpec(shape, lambda i: (0, 0))

    kernel = functools.partial(actor_kernel, out_size=out_size)

    slab = pl.pallas_call(
        kernel,
        out_shape=jax.ShapeDtypeStruct((b_pad, n_pad), jnp.float32),
        grid=(nb,),
        in_specs=[
            x_spec,
            resident(w1k.shape), resident(b1.shape),
            resident(w2k.shape), resident(b2.shape),
            resident(whk.shape), resident(bh.shape),
        ],
        out_specs=out_spec,
        compiler_params=pltpu.CompilerParams(
            dimension_semantics=("parallel",)),
    )(xk, w1k, b1, w2k, b2, whk, bh)

    slab = slab[:B]
    return slab[:, :out_size], slab[:, out_size:n2]


def init_actor_params(key, input_size, output_size):
    """Deterministic synthetic init (PyTorch-style uniform fan-in bounds)."""
    def linear(k, fan_in, fan_out):
        k_w, k_b = jax.random.split(k)
        bound = 1.0 / jnp.sqrt(fan_in)
        w = jax.random.uniform(k_w, (fan_in, fan_out), jnp.float32, -bound, bound)
        b = jax.random.uniform(k_b, (1, fan_out), jnp.float32, -bound, bound)
        return w, b

    k1, k2, k3, k4 = jax.random.split(key, 4)
    w1, b1 = linear(k1, input_size, hidden_size)
    w2, b2 = linear(k2, hidden_size, hidden_size)
    wm, bm = linear(k3, hidden_size, output_size)
    wls, bls = linear(k4, hidden_size, output_size)
    return (w1, b1, w2, b2, wm, bm, wls, bls)


if __name__ == "__main__":
    key = jax.random.PRNGKey(0)
    k_param, k_x = jax.random.split(key)

    batch = 10          # not a multiple of 8 -> exercises the padding path
    input_size = 32
    output_size = 8

    params = init_actor_params(k_param, input_size, output_size)
    x = jax.random.normal(k_x, (batch, input_size), dtype=jnp.float32)

    mean, logstd = actor_forward(x, params)
    jax.block_until_ready((mean, logstd))

    w1, b1, w2, b2, wm, bm, wls, bls = params

    # bf16-consistent reference (same casts / fusion as the kernel)
    bf = jnp.bfloat16
    h1 = jnp.maximum(
        jnp.dot(x.astype(bf), w1.astype(bf), preferred_element_type=jnp.float32) + b1, 0.0)
    h2 = jnp.maximum(
        jnp.dot(h1.astype(bf), w2.astype(bf), preferred_element_type=jnp.float32) + b2, 0.0)
    wh = jnp.concatenate([wm, wls], axis=1).astype(bf)
    bh = jnp.concatenate([bm, bls], axis=1)
    heads = jnp.dot(h2.astype(bf), wh, preferred_element_type=jnp.float32) + bh
    ref_mean = heads[:, :output_size]
    ref_logstd = jnp.clip(heads[:, output_size:], logstd_min, logstd_max)

    # full-f32 reference (module semantics; bf16 is a small precision tradeoff)
    hf = jnp.maximum(x @ w1 + b1, 0.0)
    hf = jnp.maximum(hf @ w2 + b2, 0.0)
    ref_mean_f32 = hf @ wm + bm
    ref_logstd_f32 = jnp.clip(hf @ wls + bls, logstd_min, logstd_max)

    assert mean.shape == (batch, output_size)
    assert logstd.shape == (batch, output_size)
    assert jnp.allclose(mean, ref_mean, atol=1e-4, rtol=1e-4)
    assert jnp.allclose(logstd, ref_logstd, atol=1e-4, rtol=1e-4)
    assert jnp.allclose(mean, ref_mean_f32, atol=5e-2, rtol=5e-2)
    assert jnp.allclose(logstd, ref_logstd_f32, atol=5e-2, rtol=5e-2)
    assert float(logstd.max()) <= logstd_max and float(logstd.min()) >= logstd_min

    print("KERNEL_OK")
</pallas_src>

<mosaic_0001>
module attributes {stable_mosaic.version = 11 : i64} {
  func.func @actor_kernel(%arg0: i32, %arg1: memref<16x32xbf16, #tpu.memory_space<vmem>>, %arg2: memref<32x256xbf16, #tpu.memory_space<vmem>>, %arg3: memref<1x256xf32, #tpu.memory_space<vmem>>, %arg4: memref<256x256xbf16, #tpu.memory_space<vmem>>, %arg5: memref<1x256xf32, #tpu.memory_space<vmem>>, %arg6: memref<256x128xbf16, #tpu.memory_space<vmem>>, %arg7: memref<1x128xf32, #tpu.memory_space<vmem>>, %arg8: memref<16x128xf32, #tpu.memory_space<vmem>>) attributes {dimension_semantics = [#tpu.dimension_semantics<parallel>], iteration_bounds = array<i64: 1>, scalar_prefetch = 0 : i64, scratch_operands = 0 : i64, tpu.core_type = #tpu.core_type<tc>, window_params = [{transform_indices = @transform_0, window_bounds = array<i64: 16, 32>}, {pipeline_mode = #tpu.pipeline_mode<synchronous>, transform_indices = @transform_1, window_bounds = array<i64: 32, 256>}, {pipeline_mode = #tpu.pipeline_mode<synchronous>, transform_indices = @transform_2, window_bounds = array<i64: 1, 256>}, {pipeline_mode = #tpu.pipeline_mode<synchronous>, transform_indices = @transform_3, window_bounds = array<i64: 256, 256>}, {pipeline_mode = #tpu.pipeline_mode<synchronous>, transform_indices = @transform_4, window_bounds = array<i64: 1, 256>}, {pipeline_mode = #tpu.pipeline_mode<synchronous>, transform_indices = @transform_5, window_bounds = array<i64: 256, 128>}, {pipeline_mode = #tpu.pipeline_mode<synchronous>, transform_indices = @transform_6, window_bounds = array<i64: 1, 128>}, {transform_indices = @transform_7, window_bounds = array<i64: 16, 128>}]} {
    %c0 = arith.constant 0 : index
    %c0_0 = arith.constant 0 : index
    %0 = vector.load %arg1[%c0, %c0_0] : memref<16x32xbf16, #tpu.memory_space<vmem>>, vector<16x32xbf16>
    %c0_1 = arith.constant 0 : index
    %c0_2 = arith.constant 0 : index
    %1 = vector.load %arg2[%c0_1, %c0_2] : memref<32x256xbf16, #tpu.memory_space<vmem>>, vector<32x256xbf16>
    %cst = arith.constant dense<0.000000e+00> : vector<16x256xf32>
    %2 = tpu.matmul %0, %1, %cst {dimension_numbers = #tpu.dot_dimension_numbers<[1], [0], [0], [1], [0, 0, 1, 1], [], []>} : vector<16x32xbf16>, vector<32x256xbf16>, vector<16x256xf32> -> vector<16x256xf32>
    %c0_3 = arith.constant 0 : index
    %c0_4 = arith.constant 0 : index
    %3 = vector.load %arg3[%c0_3, %c0_4] : memref<1x256xf32, #tpu.memory_space<vmem>>, vector<1x256xf32>
    %4 = vector.broadcast %3 : vector<1x256xf32> to vector<16x256xf32>
    %5 = arith.addf %2, %4 : vector<16x256xf32>
    %cst_5 = arith.constant 0.000000e+00 : f32
    %6 = vector.broadcast %cst_5 : f32 to vector<16x256xf32>
    %7 = arith.maximumf %5, %6 : vector<16x256xf32>
    %8 = arith.truncf %7 : vector<16x256xf32> to vector<16x256xbf16>
    %c0_6 = arith.constant 0 : index
    %c0_7 = arith.constant 0 : index
    %9 = vector.load %arg4[%c0_6, %c0_7] : memref<256x256xbf16, #tpu.memory_space<vmem>>, vector<256x256xbf16>
    %cst_8 = arith.constant dense<0.000000e+00> : vector<16x256xf32>
    %10 = tpu.matmul %8, %9, %cst_8 {dimension_numbers = #tpu.dot_dimension_numbers<[1], [0], [0], [1], [0, 0, 1, 1], [], []>} : vector<16x256xbf16>, vector<256x256xbf16>, vector<16x256xf32> -> vector<16x256xf32>
    %c0_9 = arith.constant 0 : index
    %c0_10 = arith.constant 0 : index
    %11 = vector.load %arg5[%c0_9, %c0_10] : memref<1x256xf32, #tpu.memory_space<vmem>>, vector<1x256xf32>
    %12 = vector.broadcast %11 : vector<1x256xf32> to vector<16x256xf32>
    %13 = arith.addf %10, %12 : vector<16x256xf32>
    %cst_11 = arith.constant 0.000000e+00 : f32
    %14 = vector.broadcast %cst_11 : f32 to vector<16x256xf32>
    %15 = arith.maximumf %13, %14 : vector<16x256xf32>
    %16 = arith.truncf %15 : vector<16x256xf32> to vector<16x256xbf16>
    %c0_12 = arith.constant 0 : index
    %c0_13 = arith.constant 0 : index
    %17 = vector.load %arg6[%c0_12, %c0_13] : memref<256x128xbf16, #tpu.memory_space<vmem>>, vector<256x128xbf16>
    %cst_14 = arith.constant dense<0.000000e+00> : vector<16x128xf32>
    %18 = tpu.matmul %16, %17, %cst_14 {dimension_numbers = #tpu.dot_dimension_numbers<[1], [0], [0], [1], [0, 0, 1, 1], [], []>} : vector<16x256xbf16>, vector<256x128xbf16>, vector<16x128xf32> -> vector<16x128xf32>
    %c0_15 = arith.constant 0 : index
    %c0_16 = arith.constant 0 : index
    %19 = vector.load %arg7[%c0_15, %c0_16] : memref<1x128xf32, #tpu.memory_space<vmem>>, vector<1x128xf32>
    %20 = vector.broadcast %19 : vector<1x128xf32> to vector<16x128xf32>
    %21 = arith.addf %18, %20 : vector<16x128xf32>
    %22 = tpu.iota {dimensions = array<i32: 1>} : vector<16x128xi32>
    %cst_17 = arith.constant -2.000000e+01 : f32
    %cst_18 = arith.constant 2.000000e+00 : f32
    %23 = vector.broadcast %cst_17 : f32 to vector<16x128xf32>
    %24 = arith.maximumf %23, %21 : vector<16x128xf32>
    %25 = vector.broadcast %cst_18 : f32 to vector<16x128xf32>
    %26 = arith.minimumf %25, %24 : vector<16x128xf32>
    %c8_i32 = arith.constant 8 : i32
    %27 = vector.broadcast %c8_i32 : i32 to vector<16x128xi32>
    %28 = arith.cmpi sge, %22, %27 : vector<16x128xi32>
    %29 = arith.select %28, %26, %21 : vector<16x128xi1>, vector<16x128xf32>
    %c0_19 = arith.constant 0 : index
    %c0_20 = arith.constant 0 : index
    %30 = vector.load %arg8[%c0_19, %c0_20] : memref<16x128xf32, #tpu.memory_space<vmem>>, vector<16x128xf32>
    tpu.vector_store %arg8[%c0_19, %c0_20], %29 {strides = array<i32>} : memref<16x128xf32, #tpu.memory_space<vmem>>, vector<16x128xf32>,
    return
  }
  func.func @transform_0(%arg0: i32) -> (i32, i32) {
    %c0_i32 = arith.constant 0 : i32
    %c0_i32_0 = arith.constant 0 : i32
    return %arg0, %c0_i32 : i32, i32
  }
  func.func @transform_1(%arg0: i32) -> (i32, i32) {
    %c0_i32 = arith.constant 0 : i32
    %c0_i32_0 = arith.constant 0 : i32
    %c0_i32_1 = arith.constant 0 : i32
    return %c0_i32, %c0_i32_0 : i32, i32
  }
  func.func @transform_2(%arg0: i32) -> (i32, i32) {
    %c0_i32 = arith.constant 0 : i32
    %c0_i32_0 = arith.constant 0 : i32
    %c0_i32_1 = arith.constant 0 : i32
    return %c0_i32, %c0_i32_0 : i32, i32
  }
  func.func @transform_3(%arg0: i32) -> (i32, i32) {
    %c0_i32 = arith.constant 0 : i32
    %c0_i32_0 = arith.constant 0 : i32
    %c0_i32_1 = arith.constant 0 : i32
    return %c0_i32, %c0_i32_0 : i32, i32
  }
  func.func @transform_4(%arg0: i32) -> (i32, i32) {
    %c0_i32 = arith.constant 0 : i32
    %c0_i32_0 = arith.constant 0 : i32
    %c0_i32_1 = arith.constant 0 : i32
    return %c0_i32, %c0_i32_0 : i32, i32
  }
  func.func @transform_5(%arg0: i32) -> (i32, i32) {
    %c0_i32 = arith.constant 0 : i32
    %c0_i32_0 = arith.constant 0 : i32
    %c0_i32_1 = arith.constant 0 : i32
    return %c0_i32, %c0_i32_0 : i32, i32
  }
  func.func @transform_6(%arg0: i32) -> (i32, i32) {
    %c0_i32 = arith.constant 0 : i32
    %c0_i32_0 = arith.constant 0 : i32
    %c0_i32_1 = arith.constant 0 : i32
    return %c0_i32, %c0_i32_0 : i32, i32
  }
  func.func @transform_7(%arg0: i32) -> (i32, i32) {
    %c0_i32 = arith.constant 0 : i32
    %c0_i32_0 = arith.constant 0 : i32
    return %arg0, %c0_i32 : i32, i32
  }
}

</mosaic_0001>

<bundles_post_ra>
// kernel: actor_forward.1
= control target key start
LH: loop header
LB: loop body
LE: loop exit
PB: predicated region body
PF: predicated region fallthrough
CT: control target
= control target key end

     0   :  { %v716_v1 = vmov 0   ;;  %vm70_vm0 = vcmask 261120   ;;  %v35_v49 = vlaneseq  ;;  %s931_s1 = inlined_call_operand.vmem [shape: bf16[32,256], index: 1, kind: input, shape index: {}]   ;;  %s932_s0 = inlined_call_operand.vmem [shape: bf16[16,32], index: 0, kind: input, shape index: {}]   ;;  %s933_s3 = inlined_call_operand.vmem [shape: bf16[256,256], index: 3, kind: input, shape index: {}]   ;;  %s934_s5 = inlined_call_operand.vmem [shape: bf16[256,128], index: 5, kind: input, shape index: {}]   ;;  %s935_s2 = inlined_call_operand.vmem [shape: f32[1,256], index: 2, kind: input, shape index: {}]   ;;  %s936_s4 = inlined_call_operand.vmem [shape: f32[1,256], index: 4, kind: input, shape index: {}]   ;;  %s937_s6 = inlined_call_operand.vmem [shape: f32[1,128], index: 6, kind: input, shape index: {}]   ;;  %s938_s7 = inlined_call_operand.vmem [shape: f32[16,128], index: 7, kind: output, shape index: {}]  }
   0x1   :  { %v645_v0 = vld [vmem:[%s931_s1 + $0x4] ss:$8 sps:$4 sm:$0xff]   ;;  %106 = vmatprep.mubr.bf16.mxu0 %v716_v1  ;;  %v647_v2 = vld [vmem:[%s931_s1] ss:$8 sps:$4 sm:$0xff]   ;;  %v648_v3 = vld [vmem:[%s931_s1 + $0x14] ss:$8 sps:$4 sm:$0xff]  }
   0x2   :  { %74 = vmatprep.subr.bf16.mxu0 %v645_v0  ;;  %v650_v4 = vld [vmem:[%s931_s1 + $0x10] ss:$8 sps:$4 sm:$0xff]   ;;  %v652_v5 = vld [vmem:[%s933_s3 + $0x4] ss:$8 sps:$4 sm:$0xff]   ;;  %v654_v6 = vld [vmem:[%s933_s3] ss:$8 sps:$4 sm:$0xff]  }
   0x3   :  { %75 = vmatpush1.bf16.msra.mxu0 %v647_v2  ;;  %v655_v7 = vld [vmem:[%s933_s3 + $0x14] ss:$8 sps:$4 sm:$0xff]   ;;  %v651_v8 = vld [vmem:[%s932_s0] sm:$0xff]   ;;  %327 = vmatprep.subr.bf16.mxu1 %v652_v5  ;;  %v657_v9 = vld [vmem:[%s933_s3 + $0x10] ss:$8 sps:$4 sm:$0xff]   ;;  %v36_v50 = vshrl.u32 %v35_v49, 7 }
   0x4   :  { %76 = vmatprep.subr.bf16.mxu0 %v648_v3  ;;  %328 = vmatpush1.bf16.msra.mxu1 %v654_v6  ;;  %v658_v10 = vld [vmem:[%s933_s3 + $0x24] ss:$8 sps:$4 sm:$0xff]   ;;  %v660_v11 = vld [vmem:[%s933_s3 + $0x20] ss:$8 sps:$4 sm:$0xff]   ;;  %v661_v12 = vld [vmem:[%s933_s3 + $0x34] ss:$8 sps:$4 sm:$0xff]  }
   0x5   :  { %329 = vmatprep.subr.bf16.mxu1 %v655_v7  ;;  %v663_v13 = vld [vmem:[%s933_s3 + $0x30] ss:$8 sps:$4 sm:$0xff]   ;;  %v664_v14 = vld [vmem:[%s933_s3 + $0x44] ss:$8 sps:$4 sm:$0xff]   ;;  %v666_v15 = vld [vmem:[%s933_s3 + $0x40] ss:$8 sps:$4 sm:$0xff]  }
   0x6   :  { %v667_v16 = vld [vmem:[%s933_s3 + $0x54] ss:$8 sps:$4 sm:$0xff]   ;;  %v669_v17 = vld [vmem:[%s933_s3 + $0x50] ss:$8 sps:$4 sm:$0xff]   ;;  %v670_v18 = vld [vmem:[%s933_s3 + $0x64] ss:$8 sps:$4 sm:$0xff]  }
   0x7   :  { %77 = vmatpush1.bf16.msra.mxu0 %v650_v4  ;;  %v672_v19 = vld [vmem:[%s933_s3 + $0x60] ss:$8 sps:$4 sm:$0xff]   ;;  %v673_v20 = vld [vmem:[%s933_s3 + $0x74] ss:$8 sps:$4 sm:$0xff]   ;;  %v675_v21 = vld [vmem:[%s933_s3 + $0x70] ss:$8 sps:$4 sm:$0xff]  }
   0x8   :  { %330 = vmatpush1.bf16.msra.mxu1 %v657_v9  ;;  %v676_v22 = vld [vmem:[%s933_s3 + $0x84] ss:$8 sps:$4 sm:$0xff]   ;;  %v678_v23 = vld [vmem:[%s933_s3 + $0x80] ss:$8 sps:$4 sm:$0xff]   ;;  %v679_v24 = vld [vmem:[%s933_s3 + $0x94] ss:$8 sps:$4 sm:$0xff]  }
   0x9   :  { %331 = vmatprep.subr.bf16.mxu1 %v658_v10  ;;  %v681_v25 = vld [vmem:[%s933_s3 + $0x90] ss:$8 sps:$4 sm:$0xff]   ;;  %v682_v26 = vld [vmem:[%s933_s3 + $0xa4] ss:$8 sps:$4 sm:$0xff]   ;;  %v684_v27 = vld [vmem:[%s933_s3 + $0xa0] ss:$8 sps:$4 sm:$0xff]  }
   0xa   :  { %572 = vmatmul.mubr.msk.bf16.vlgmr.msra.gmra.mrb[0].mxu0 %vm70_vm0, %v651_v8  ;;  %v685_v28 = vld [vmem:[%s933_s3 + $0xb4] ss:$8 sps:$4 sm:$0xff]   ;;  %v687_v29 = vld [vmem:[%s933_s3 + $0xb0] ss:$8 sps:$4 sm:$0xff]   ;;  %v688_v30 = vld [vmem:[%s933_s3 + $0xc4] ss:$8 sps:$4 sm:$0xff]  }
   0xb   :  { %v690_v31 = vld [vmem:[%s933_s3 + $0xc0] ss:$8 sps:$4 sm:$0xff]   ;;  %v691_v32 = vld [vmem:[%s933_s3 + $0xd4] ss:$8 sps:$4 sm:$0xff]   ;;  %v693_v33 = vld [vmem:[%s933_s3 + $0xd0] ss:$8 sps:$4 sm:$0xff]  }
   0xc   :  { %332 = vmatpush1.bf16.msra.mxu1 %v660_v11  ;;  %v694_v34 = vld [vmem:[%s933_s3 + $0xe4] ss:$8 sps:$4 sm:$0xff]   ;;  %v696_v35 = vld [vmem:[%s933_s3 + $0xe0] ss:$8 sps:$4 sm:$0xff]   ;;  %v697_v36 = vld [vmem:[%s933_s3 + $0xf4] ss:$8 sps:$4 sm:$0xff]  }
   0xd   :  { %333 = vmatprep.subr.bf16.mxu1 %v661_v12  ;;  %v699_v37 = vld [vmem:[%s933_s3 + $0xf0] ss:$8 sps:$4 sm:$0xff]   ;;  %v700_v38 = vld [vmem:[%s934_s5 + $0x40] sm:$0xff]   ;;  %v702_v40 = vld [vmem:[%s934_s5 + $0x48] sm:$0xff]   ;;  %v37_v51 = vsub.s32 0, %v36_v50  ;;  %v41_v53 = vsub.s32 1, %v36_v50 }
   0xe   :  { %v701_v39 = vld [vmem:[%s934_s5] sm:$0xff]   ;;  %622 = vmatprep.subr.bf16.mxu0 %v700_v38  ;;  %v703_v41 = vld [vmem:[%s934_s5 + $0x8] sm:$0xff]   ;;  %v704_v42 = vld [vmem:[%s934_s5 + $0x50] sm:$0xff]  }
   0xf   :  { %623 = vmatpush3.bf16.msra.mxu0 %v701_v39  ;;  %v705_v43 = vld [vmem:[%s934_s5 + $0x10] sm:$0xff]   ;;  %v706_v44 = vld [vmem:[%s934_s5 + $0x58] sm:$0xff]   ;;  %v708_v46 = vld [vmem:[%s934_s5 + $0x60] sm:$0xff]  }
  0x10   :  { %334 = vmatpush1.bf16.msra.mxu1 %v663_v13  ;;  %624 = vmatprep.subr.bf16.mxu0 %v702_v40  ;;  %v707_v45 = vld [vmem:[%s934_s5 + $0x18] sm:$0xff]   ;;  %v709_v47 = vld [vmem:[%s934_s5 + $0x20] sm:$0xff]   ;;  %v710_v48 = vld [vmem:[%s934_s5 + $0x68] sm:$0xff]  }
  0x11   :  { %335 = vmatprep.subr.bf16.mxu1 %v664_v14  ;;  %v33_v52 = vld [vmem:[%s935_s2] sm:$0x3]  ;;  %v711_v6 = vld [vmem:[%s934_s5 + $0x28] sm:$0xff]   ;;  %v712_v7 = vld [vmem:[%s934_s5 + $0x70] sm:$0xff]  }
  0x12   :  { %v38_v54 = vrot.slane %v33_v52, %v37_v51  ;;  %v42_v55 = vrot.slane %v33_v52, %v41_v53  ;;  %v713_v8 = vld [vmem:[%s934_s5 + $0x30] sm:$0xff]   ;;  %v714_v9 = vld [vmem:[%s934_s5 + $0x78] sm:$0xff]   ;;  %v155_v11 = vld [vmem:[%s936_s4] sm:$0x3] }
  0x13   :  { %625 = vmatpush3.bf16.msra.mxu0 %v703_v41  ;;  %v715_v10 = vld [vmem:[%s934_s5 + $0x38] sm:$0xff]   ;;  %v160_v12 = vrot.slane %v155_v11, %v37_v51  ;;  %v164_v13 = vrot.slane %v155_v11, %v41_v53 }
  0x14   :  { %336 = vmatpush1.bf16.msra.mxu1 %v666_v15  ;;  %626 = vmatprep.subr.bf16.mxu0 %v704_v42 }
  0x15   :  { %337 = vmatprep.subr.bf16.mxu1 %v667_v16 }
  0x17   :  { %627 = vmatpush3.bf16.msra.mxu0 %v705_v43 }
  0x18   :  { %338 = vmatpush1.bf16.msra.mxu1 %v669_v17  ;;  %628 = vmatprep.subr.bf16.mxu0 %v706_v44 }
  0x19   :  { %339 = vmatprep.subr.bf16.mxu1 %v670_v18 }
  0x1b   :  { %629 = vmatpush3.bf16.msra.mxu0 %v707_v45 }
  0x1c   :  { %340 = vmatpush1.bf16.msra.mxu1 %v672_v19  ;;  %630 = vmatprep.subr.bf16.mxu0 %v708_v46 }
  0x1d   :  { %341 = vmatprep.subr.bf16.mxu1 %v673_v20 }
  0x1f   :  { %631 = vmatpush3.bf16.msra.mxu0 %v709_v47 }
  0x20   :  { %342 = vmatpush1.bf16.msra.mxu1 %v675_v21  ;;  %632 = vmatprep.subr.bf16.mxu0 %v710_v48 }
  0x21   :  { %343 = vmatprep.subr.bf16.mxu1 %v676_v22 }
  0x23   :  { %633 = vmatpush3.bf16.msra.mxu0 %v711_v6 }
  0x24   :  { %344 = vmatpush1.bf16.msra.mxu1 %v678_v23  ;;  %634 = vmatprep.subr.bf16.mxu0 %v712_v7 }
  0x25   :  { %345 = vmatprep.subr.bf16.mxu1 %v679_v24 }
  0x27   :  { %635 = vmatpush3.bf16.msra.mxu0 %v713_v8 }
  0x28   :  { %346 = vmatpush1.bf16.msra.mxu1 %v681_v25  ;;  %636 = vmatprep.subr.bf16.mxu0 %v714_v9 }
  0x29   :  { %347 = vmatprep.subr.bf16.mxu1 %v682_v26 }
  0x2b   :  { %637 = vmatpush3.bf16.msra.mxu0 %v715_v10 }
  0x2c   :  { %348 = vmatpush1.bf16.msra.mxu1 %v684_v27 }
  0x2d   :  { %349 = vmatprep.subr.bf16.mxu1 %v685_v28 }
  0x30   :  { %350 = vmatpush1.bf16.msra.mxu1 %v687_v29  ;;  %v605_v29 = vld [vmem:[%s937_s6] ss:$0 sm:$0xff] }
  0x31   :  { %351 = vmatprep.subr.bf16.mxu1 %v688_v30 }
  0x34   :  { %352 = vmatpush1.bf16.msra.mxu1 %v690_v31 }
  0x35   :  { %353 = vmatprep.subr.bf16.mxu1 %v691_v32 }
  0x38   :  { %354 = vmatpush1.bf16.msra.mxu1 %v693_v33  ;;  %v553_v33 = vand.u32 127, %v35_v49 }
  0x39   :  { %355 = vmatprep.subr.bf16.mxu1 %v694_v34 }
  0x3a   :  { %vm558_vm1 = vcmp.ge.s32.totalorder %v553_v33, 8 }
  0x3c   :  { %356 = vmatpush1.bf16.msra.mxu1 %v696_v35 }
  0x3d   :  { %357 = vmatprep.subr.bf16.mxu1 %v697_v36 }
  0x40   :  { %358 = vmatpush1.bf16.msra.mxu1 %v699_v37 }
  0xdd   :  { %v108_v56 = vpop.f32.mrb[0].mxu0 }
  0xde   :  { %v109_v57 = vadd.f32 %v108_v56, %v38_v54  ;;  %v110_v58 = vpop.f32.mrb[1].mxu0 }
  0xdf   :  { %v111_v59 = vadd.f32 %v110_v58, %v42_v55  ;;  %v112_v60 = vpop.f32.mrb[2].mxu0 }
  0xe0   :  { %v113_v61 = vadd.f32 %v112_v60, %v38_v54  ;;  %v114_v62 = vpop.f32.mrb[3].mxu0  ;;  %v117_v0 = vmax.f32 %v109_v57, 0.0 }
  0xe1   :  { %v115_v63 = vadd.f32 %v114_v62, %v42_v55  ;;  %v118_v2 = vmax.f32 %v111_v59, 0.0 }
  0xe2   :  { %v119_v1 = vmax.f32 %v113_v61, 0.0 }
  0xe3   :  { %v120_v3 = vmax.f32 %v115_v63, 0.0 }
  0xe4   :  { %v121_v4 = vpack.c.bf16 %v119_v1, %v117_v0 }
  0xe5   :  { %v122_v5 = vpack.c.bf16 %v120_v3, %v118_v2 }
  0xe7   :  { %359 = vmatprep.mubr.bf16.mxu1 %v122_v5 }
  0xe8   :  { %360 = vmatmul.mubr.bf16.vlgmr.msra.gmra.mrb[0].mxu1 %v121_v4 }
 0x1bb   :  { %v361_v14 = vpop.f32.mrb[0].mxu1 }
 0x1bc   :  { %v362_v15 = vadd.f32 %v361_v14, %v160_v12  ;;  %v363_v16 = vpop.f32.mrb[1].mxu1 }
 0x1bd   :  { %v364_v17 = vadd.f32 %v363_v16, %v164_v13  ;;  %v365_v18 = vpop.f32.mrb[2].mxu1 }
 0x1be   :  { %v366_v19 = vadd.f32 %v365_v18, %v160_v12  ;;  %v367_v20 = vpop.f32.mrb[3].mxu1  ;;  %v370_v22 = vmax.f32 %v362_v15, 0.0 }
 0x1bf   :  { %v368_v21 = vadd.f32 %v367_v20, %v164_v13  ;;  %v371_v24 = vmax.f32 %v364_v17, 0.0 }
 0x1c0   :  { %v372_v23 = vmax.f32 %v366_v19, 0.0 }
 0x1c1   :  { %v373_v25 = vmax.f32 %v368_v21, 0.0 }
 0x1c2   :  { %v374_v26 = vpack.c.bf16 %v372_v23, %v370_v22 }
 0x1c3   :  { %v375_v27 = vpack.c.bf16 %v373_v25, %v371_v24 }
 0x1c5   :  { %543 = vmatprep.mubr.bf16.mxu0 %v375_v27 }
 0x1c6   :  { %544 = vmatmul.mubr.bf16.vlgmr.msra.gmra.mrb[4].mxu0 %v374_v26 }
 0x299   :  { %v638_v28 = vpop.f32.mrb[4].mxu0 }
 0x29a   :  { %v639_v30 = vpop.f32.mrb[5].mxu0 }
 0x29b   :  { %v640_v31 = vadd.f32 %v639_v30, %v638_v28  ;;  %v641_v32 = vpop.f32.mrb[6].mxu0 }
 0x29c   :  { %v642_v34 = vpop.f32.mrb[7].mxu0 }
 0x29d   :  { %v546_v35 = vadd.f32 %v640_v31, %v605_v29  ;;  %v643_v36 = vadd.f32 %v642_v34, %v641_v32 }
 0x29f   :  { %v554_v37 = vmax.f32 %v546_v35, -20.0  ;;  %v549_v38 = vadd.f32 %v643_v36, %v605_v29 }
 0x2a1   :  { %v556_v39 = vmin.f32 %v554_v37, 2.0  ;;  %v555_v40 = vmax.f32 %v549_v38, -20.0 }
 0x2a3   :  { %v559_v41 = vsel %vm558_vm1, %v556_v39, %v546_v35  ;;  %v557_v42 = vmin.f32 %v555_v40, 2.0 }
 0x2a4   :  { %561 = vst [vmem:[%s938_s7] sm:$0xff] %v559_v41 }
 0x2a5   :  { %v560_v43 = vsel %vm558_vm1, %v557_v42, %v549_v38 }
 0x2a6   :  { %562 = vst [vmem:[%s938_s7 + $0x8] sm:$0xff] %v560_v43 }

</bundles_post_ra>
